<compile_context>
chip_gen: v7x
topology: tpu7x:2x2x1
jax: 0.10.0
libtpu: 0.0.40
codegen_flags: <defaults>
</compile_context>

<pallas_src>
import numpy as np
import jax
import jax.numpy as jnp
from jax.experimental import pallas as pl
from jax.experimental.pallas import tpu as pltpu


def _norm_kernel(coef_ref, x_ref, o_ref):
    """coef_ref: VMEM (4, LANE) per-lane rows: a (self), b (next), c (prev), bias.
    x_ref / o_ref: VMEM (TR, LANE), interleaved re/im along lanes (even=re, odd=im)."""
    x = x_ref[...]                                   # (TR, LANE)
    lane = x.shape[-1]

    a    = coef_ref[0:1, :]                          # (1, LANE) -> broadcast over rows
    b_nx = coef_ref[1:2, :]                          # inv_xy on even lanes, 0 on odd
    c_pv = coef_ref[2:3, :]                          # inv_yx on odd lanes, 0 on even
    bias = coef_ref[3:4, :]

    # XLU rotations (slot otherwise idle in this VPU/store-bound kernel).
    x_next = pltpu.roll(x, shift=lane - 1, axis=1)   # x_next[i] = x[i+1]
    x_prev = pltpu.roll(x, shift=1, axis=1)          # x_prev[i] = x[i-1]

    out = a * x + b_nx * x_next + c_pv * x_prev + bias
    o_ref[...] = jnp.clip(out, -6.0, 6.0)


_TARGET_BLOCK_BYTES = 2 << 20   # ~2 MiB blocks: ≥85% HBM roofline, safe on v5e defaults


def _choose_tiling(n_elems, itemsize=4, target_bytes=_TARGET_BLOCK_BYTES):
    """Factor per-batch element count into a lane-dense [R, LANE] layout and pick
    a row tile TR targeting ~target_bytes per block.

    Returns (n_pad, R, LANE, TR) with n_pad >= n_elems a multiple of LANE (and of
    TR*LANE when row padding was required), LANE a multiple of 128, and TR either
    a multiple of 8 or equal to R (both legal block shapes)."""
    lane = 1024
    while lane > 128 and n_elems < lane:
        lane //= 2
    n_pad = -(-n_elems // lane) * lane
    rows = n_pad // lane
    max_rows = max(8, target_bytes // (lane * itemsize))

    if rows <= max_rows:
        return n_pad, rows, lane, rows                 # single block per batch

    # Largest multiple-of-8 divisor of `rows` within the byte budget.
    tr = 0
    t = (max_rows // 8) * 8
    while t >= 8:
        if rows % t == 0:
            tr = t
            break
        t -= 8
    if tr * lane * itemsize >= (512 << 10):            # decent divisor (>= 512 KiB block)
        return n_pad, rows, lane, tr

    # Awkward row count (prime-ish): pad rows up to a multiple of a ~1 MiB tile
    # instead of collapsing to a full-slab block (avoids VMEM blowups).
    tr = max(8, ((max_rows // 2) // 8) * 8)
    rows = -(-rows // tr) * tr
    return rows * lane, rows, lane, tr


def complex_instance_norm_forward(x, params):
    """x: [B, S, H, W, 2] float32.
    params: [B, 6] float32 = (mean_re, mean_im, cov_xx_half, cov_xy_half,
                              cov_yx_half, cov_yy_half)  -- the module's state.
    Returns: [B, S, H, W, 2] float32 (ComplexInstanceNorm.forward output)."""
    orig_shape = x.shape
    B = x.shape[0]
    assert x.shape[-1] == 2
    N = int(np.prod(x.shape[1:]))

    x = x.astype(jnp.float32)
    params = params.astype(jnp.float32)

    # --- Hoisted scalar precompute on the tiny [B, 6] array (plain JAX). -----
    mean_re, mean_im = params[:, 0], params[:, 1]
    cxx, cxy, cyx, cyy = params[:, 2], params[:, 3], params[:, 4], params[:, 5]
    rdet = 1.0 / (cxx * cyy - cxy * cyx)               # matches PyTorch: no eps
    inv_xx, inv_xy = cyy * rdet, -cxy * rdet
    inv_yx, inv_yy = -cyx * rdet, cxx * rdet
    bias_e = -(inv_xx * mean_re + inv_xy * mean_im)    # even lanes (real part)
    bias_o = -(inv_yx * mean_re + inv_yy * mean_im)    # odd lanes (imag part)

    # --- Lane-dense single-pass layout. --------------------------------------
    n_pad, R, LANE, TR = _choose_tiling(N)

    # Per-lane coefficient rows: tiny [B, 4, LANE], O(B*LANE) work in the wrapper.
    even = (jnp.arange(LANE, dtype=jnp.int32) % 2 == 0)[None, :]      # (1, LANE)

    def rows(ev, od):
        return jnp.where(even, ev[:, None], od[:, None])              # (B, LANE)

    zero = jnp.zeros_like(inv_xx)
    coef = jnp.stack(
        [rows(inv_xx, inv_yy),      # a:      multiplies x[i]
         rows(inv_xy, zero),        # b_next: multiplies x[i+1] (even lanes only)
         rows(zero, inv_yx),        # c_prev: multiplies x[i-1] (odd lanes only)
         rows(bias_e, bias_o)],     # bias
        axis=1).astype(jnp.float32)                                   # (B, 4, LANE)

    xf = x.reshape(B, N)
    if n_pad != N:
        xf = jnp.pad(xf, ((0, 0), (0, n_pad - N)))     # keep every store lane-dense
    xf = xf.reshape(B, R, LANE)

    grid = (B, R // TR)
    x_spec = pl.BlockSpec((None, TR, LANE), lambda b, r: (b, r, 0))
    coef_spec = pl.BlockSpec((None, 4, LANE), lambda b, r: (b, 0, 0))   # resident over r

    cost = pl.CostEstimate(
        flops=8 * B * n_pad,
        transcendentals=0,
        bytes_accessed=2 * B * n_pad * 4 + coef.size * 4,
    )

    out = pl.pallas_call(
        _norm_kernel,
        out_shape=jax.ShapeDtypeStruct((B, R, LANE), jnp.float32),
        grid_spec=pltpu.PrefetchScalarGridSpec(
            num_scalar_prefetch=0,
            grid=grid,
            in_specs=[coef_spec, x_spec],
            out_specs=x_spec,
        ),
        compiler_params=pltpu.CompilerParams(
            dimension_semantics=("parallel", "parallel")),
        cost_estimate=cost,
    )(coef, xf)

    out = out.reshape(B, n_pad)
    if n_pad != N:
        out = out[:, :N]
    return out.reshape(orig_shape)


def _reference(x, params):
    """Pure-JAX reference of ComplexInstanceNorm.normalize."""
    def col(i):
        return params[:, i].reshape(-1, 1, 1, 1)
    mean_re, mean_im = col(0), col(1)
    cxx, cxy, cyx, cyy = col(2), col(3), col(4), col(5)
    det = cxx * cyy - cxy * cyx
    ixx, ixy, iyx, iyy = cyy / det, -cxy / det, -cyx / det, cxx / det
    re = x[..., 0] - mean_re
    im = x[..., 1] - mean_im
    out_re = ixx * re + ixy * im
    out_im = iyx * re + iyy * im
    return jnp.clip(jnp.stack([out_re, out_im], axis=-1), -6.0, 6.0)


if __name__ == "__main__":
    key = jax.random.PRNGKey(0)
    B, S, H, W = 2, 4, 16, 16
    x = jax.random.normal(key, (B, S, H, W, 2), dtype=jnp.float32)

    # Test 1: default __init__ state: mean = 0, cov diag = 1/sqrt(2) -> out = sqrt(2)*x.
    inv_sqrt2 = np.float32(1.0 / np.sqrt(2.0))
    params_default = jnp.tile(
        jnp.array([[0.0, 0.0, inv_sqrt2, 0.0, 0.0, inv_sqrt2]], dtype=jnp.float32),
        (B, 1),
    )
    out = jax.block_until_ready(complex_instance_norm_forward(x, params_default))
    ref = jnp.clip(jnp.sqrt(2.0).astype(jnp.float32) * x, -6.0, 6.0)
    np.testing.assert_allclose(np.asarray(out), np.asarray(ref), rtol=1e-5, atol=1e-5)

    # Test 2: nonzero mean + full (well-conditioned) 2x2 cov half-matrix,
    # exercising off-diagonal signs and the mean-subtraction path.
    params_full = jnp.array(
        [[0.10, -0.20, 0.90, 0.15, -0.10, 0.80],
         [-0.05, 0.30, 0.60, -0.20, 0.25, 1.10]], dtype=jnp.float32)
    out2 = jax.block_until_ready(complex_instance_norm_forward(x, params_full))
    ref2 = _reference(x, params_full)
    np.testing.assert_allclose(np.asarray(out2), np.asarray(ref2), rtol=1e-5, atol=1e-5)

    # Test 3: awkward (non-128-divisible) spatial size -> exercises the padding
    # path so stores remain lane-dense.
    x3 = jax.random.normal(jax.random.PRNGKey(1), (B, 3, 10, 12, 2), dtype=jnp.float32)
    out3 = jax.block_until_ready(complex_instance_norm_forward(x3, params_full))
    ref3 = _reference(x3, params_full)
    np.testing.assert_allclose(np.asarray(out3), np.asarray(ref3), rtol=1e-5, atol=1e-5)

    print("KERNEL_OK")
</pallas_src>

<mosaic_0001>
module attributes {stable_mosaic.version = 11 : i64} {
  func.func @_norm_kernel(%arg0: i32, %arg1: i32, %arg2: memref<1x4x1024xf32, #tpu.memory_space<vmem>>, %arg3: memref<1x2x1024xf32, #tpu.memory_space<vmem>>, %arg4: memref<1x2x1024xf32, #tpu.memory_space<vmem>>) attributes {dimension_semantics = [#tpu.dimension_semantics<parallel>, #tpu.dimension_semantics<parallel>], iteration_bounds = array<i64: 2, 1>, scalar_prefetch = 0 : i64, scratch_operands = 0 : i64, tpu.core_type = #tpu.core_type<tc>, window_params = [{transform_indices = @transform_0, window_bounds = array<i64: 1, 4, 1024>}, {transform_indices = @transform_1, window_bounds = array<i64: 1, 2, 1024>}, {transform_indices = @transform_2, window_bounds = array<i64: 1, 2, 1024>}]} {
    %c0 = arith.constant 0 : index
    %c0_0 = arith.constant 0 : index
    %c0_1 = arith.constant 0 : index
    %0 = vector.load %arg3[%c0, %c0_0, %c0_1] : memref<1x2x1024xf32, #tpu.memory_space<vmem>>, vector<1x2x1024xf32>
    %1 = vector.shape_cast %0 : vector<1x2x1024xf32> to vector<2x1024xf32>
    %c0_2 = arith.constant 0 : index
    %c0_3 = arith.constant 0 : index
    %c0_4 = arith.constant 0 : index
    %2 = vector.load %arg2[%c0_2, %c0_3, %c0_4] : memref<1x4x1024xf32, #tpu.memory_space<vmem>>, vector<1x1x1024xf32>
    %3 = vector.shape_cast %2 : vector<1x1x1024xf32> to vector<1x1024xf32>
    %c0_5 = arith.constant 0 : index
    %c1 = arith.constant 1 : index
    %c0_6 = arith.constant 0 : index
    %4 = vector.load %arg2[%c0_5, %c1, %c0_6] : memref<1x4x1024xf32, #tpu.memory_space<vmem>>, vector<1x1x1024xf32>
    %5 = vector.shape_cast %4 : vector<1x1x1024xf32> to vector<1x1024xf32>
    %c0_7 = arith.constant 0 : index
    %c2 = arith.constant 2 : index
    %c0_8 = arith.constant 0 : index
    %6 = vector.load %arg2[%c0_7, %c2, %c0_8] : memref<1x4x1024xf32, #tpu.memory_space<vmem>>, vector<1x1x1024xf32>
    %7 = vector.shape_cast %6 : vector<1x1x1024xf32> to vector<1x1024xf32>
    %c0_9 = arith.constant 0 : index
    %c3 = arith.constant 3 : index
    %c0_10 = arith.constant 0 : index
    %8 = vector.load %arg2[%c0_9, %c3, %c0_10] : memref<1x4x1024xf32, #tpu.memory_space<vmem>>, vector<1x1x1024xf32>
    %9 = vector.shape_cast %8 : vector<1x1x1024xf32> to vector<1x1024xf32>
    %c1023_i32 = arith.constant 1023 : i32
    %10 = tpu.dynamic_rotate %1 by %c1023_i32 dim 1 : vector<2x1024xf32>, i32 -> vector<2x1024xf32>
    %c1_i32 = arith.constant 1 : i32
    %11 = tpu.dynamic_rotate %1 by %c1_i32 dim 1 : vector<2x1024xf32>, i32 -> vector<2x1024xf32>
    %12 = vector.broadcast %3 : vector<1x1024xf32> to vector<2x1024xf32>
    %13 = arith.mulf %12, %1 : vector<2x1024xf32>
    %14 = vector.broadcast %5 : vector<1x1024xf32> to vector<2x1024xf32>
    %15 = arith.mulf %14, %10 : vector<2x1024xf32>
    %16 = arith.addf %13, %15 : vector<2x1024xf32>
    %17 = vector.broadcast %7 : vector<1x1024xf32> to vector<2x1024xf32>
    %18 = arith.mulf %17, %11 : vector<2x1024xf32>
    %19 = arith.addf %16, %18 : vector<2x1024xf32>
    %20 = vector.broadcast %9 : vector<1x1024xf32> to vector<2x1024xf32>
    %21 = arith.addf %19, %20 : vector<2x1024xf32>
    %cst = arith.constant -6.000000e+00 : f32
    %cst_11 = arith.constant 6.000000e+00 : f32
    %22 = vector.broadcast %cst : f32 to vector<2x1024xf32>
    %23 = arith.maximumf %22, %21 : vector<2x1024xf32>
    %24 = vector.broadcast %cst_11 : f32 to vector<2x1024xf32>
    %25 = arith.minimumf %24, %23 : vector<2x1024xf32>
    %c0_12 = arith.constant 0 : index
    %c0_13 = arith.constant 0 : index
    %c0_14 = arith.constant 0 : index
    %26 = vector.load %arg4[%c0_12, %c0_13, %c0_14] : memref<1x2x1024xf32, #tpu.memory_space<vmem>>, vector<1x2x1024xf32>
    %27 = vector.shape_cast %26 : vector<1x2x1024xf32> to vector<2x1024xf32>
    %28 = vector.shape_cast %25 : vector<2x1024xf32> to vector<1x2x1024xf32>
    tpu.vector_store %arg4[%c0_12, %c0_13, %c0_14], %28 {strides = array<i32>} : memref<1x2x1024xf32, #tpu.memory_space<vmem>>, vector<1x2x1024xf32>,
    return
  }
  func.func @transform_0(%arg0: i32, %arg1: i32) -> (i32, i32, i32) {
    %c0_i32 = arith.constant 0 : i32
    %c0_i32_0 = arith.constant 0 : i32
    %c0_i32_1 = arith.constant 0 : i32
    return %arg0, %c0_i32, %c0_i32_0 : i32, i32, i32
  }
  func.func @transform_1(%arg0: i32, %arg1: i32) -> (i32, i32, i32) {
    %c0_i32 = arith.constant 0 : i32
    %c0_i32_0 = arith.constant 0 : i32
    return %arg0, %arg1, %c0_i32 : i32, i32, i32
  }
  func.func @transform_2(%arg0: i32, %arg1: i32) -> (i32, i32, i32) {
    %c0_i32 = arith.constant 0 : i32
    %c0_i32_0 = arith.constant 0 : i32
    return %arg0, %arg1, %c0_i32 : i32, i32, i32
  }
}

</mosaic_0001>

<bundles_post_ra>
// kernel: tpu_custom_call.1
= control target key start
LH: loop header
LB: loop body
LE: loop exit
PB: predicated region body
PF: predicated region fallthrough
CT: control target
= control target key end

     0   :  { %7 = vsyncpa [#allocation3], 0  ;;  %s1335_s0 = inlined_call_operand.hbm [shape: f32[2,4,1024], index: 0, kind: input, shape index: {}]   ;;  %s1336_s1 = inlined_call_operand.hbm [shape: f32[2,2,1024], index: 1, kind: input, shape index: {}]   ;;  %s1337_s2 = inlined_call_operand.hbm [shape: f32[2,2,1024], index: 2, kind: output, shape index: {}]  }
   0x1   :  { %9 = vsyncpa [#allocation3 + $0x1], 0 }
   0x2   :  { %10 = vsyncpa [#allocation6], 0 }
   0x3   :  { %12 = vsyncpa [#allocation6 + $0x1], 0 }
   0x4   :  { %13 = vsyncpa [#allocation4], 0 }
   0x5   :  { %15 = vsyncpa [#allocation4 + $0x1], 0  ;;  %s993_s9 = smov 0   ;;  %s995_s10 = smov 0  }
   0x6   :  { %s997_s11 = smov 0   ;;  %s999_s12 = smov 0  }
   0x7   :  { %s1001_s13 = smov 0   ;;  %s1003_s14 = smov 0  }
   0x8 LB: > { %s719_s15 = sadd.s32 4294967295, %s970_s14   ;;  %s720_s16 = sadd.s32 4294967294, %s970_s14   ;;  %s970_s14 = sphi %s1003_s14, %s21_s14   ;;  %s966_s13 = sphi %s1001_s13, %s1357_s13   ;;  %s962_s12 = sphi %s999_s12, %s1356_s12   ;;  %s958_s11 = sphi %s997_s11, %s1355_s11   ;;  %s954_s10 = sphi %s995_s10, %s1354_s10   ;;  %s950_s9 = sphi %s993_s9, %s1353_s9  }
   0x9   : > { %s33_s17 = sadd.s32 1, %s966_s13  ;;  %s40_s18 = sadd.s32 1, %s958_s11 }
   0xa   : > { %p35_p0 = scmp.ge.s32.totalorder %s33_s17, 2  ;;  %p47_p1 = scmp.ne.s32.totalorder %s958_s11, %s954_s10 }
   0xb   : > { %p48_p2 = scmp.eq.s32.totalorder %s970_s14, 0  ;;  %p53_p3 = scmp.ne.s32.totalorder %s954_s10, %s950_s9 }
   0xc   : > { %s1359_s17 = smov (%p35_p0, %s33_s17), 0  ;;  %p54_p5 = scmp.eq.s32.totalorder %s719_s15, 0 }
   0xd   : > { %p1034_p4 = por %p48_p2, %p47_p1  ;;  %s37_s20 = ssub.s32 %s966_s13, %s1359_s17 }
   0xe   : > { %p107_p6 = scmp.eq.s32.totalorder %s719_s15, 1  ;;  %p38_p7 = scmp.eq.s32.totalorder %s37_s20, 0 }
   0xf   : > { %p1040_p8 = por %p54_p5, %p53_p3  ;;  %p113_p10 = scmp.eq.s32.totalorder %s720_s16, 1 }
  0x10   : > { %p1044_p9 = por %p107_p6, %p47_p1  ;;  %p769_p13 = scmp.lt.s32.totalorder %s970_s14, 2 }
  0x11   : > { %s1341_s21 = scalar_select %p1040_p8, 1, 0 }
  0x12   : > { %s1342_s22 = scalar_select %p1044_p9, 1, 0 }
  0x13   : > { %s1049_s23 = scalar_select %p38_p7, %s958_s11, %s40_s18  }
  0x14   : > { %p1051_p11 = por %p113_p10, %p53_p3  ;;  %s1058_s25 = sand.u32 1, %s958_s11  }
  0x15   : > { %s723_s26 = sshll.u32 %s1058_s25, 5  ;;  %s749_s27 = sshll.u32 %s966_s13, 9 }
  0x16   : > { %s1343_s24 = scalar_select %p1051_p11, 1, 0 }
  0x17   : > { %s1065_s30 = scalar_lea.hbm %s1335_s0, %s749_s27  ;;  %s137_s3 = scalar_lea.vmem [#allocation2], %s723_s26 }
  0x18   : > { %s145_s4 = sshll.u32 %s137_s3, 4  ;;  %p1071_p0 = pnand %p769_p13, %p1034_p4  ;;  %s1067_s4 = int_to_ptr.vmem [resolvable:$true] %s145_s4 }
  0x19   : > { %s134_s6 = scalar_lea.sflag [#allocation3], %s1058_s25  ;;  %s824_s7 = scalar_lea.hbm %s1065_s30, 512 }
  0x1a   : > { %p825_p3 = scmp.ne.s32.totalorder %s1065_s30, %s824_s7  ;;  %p826_p5 = pneg %p1071_p0 }
  0x1b   : > { %s829_s16 = scalar_lea.hbm %s1335_s0, 1024  ;;  %p830_p4 = scmp.lt.u32.totalorder %s1065_s30, %s1335_s0 }
  0x1c   : > { %p827_p6 = pnand %p826_p5, %p825_p3  ;;  %p831_p10 = scmp.lt.u32.totalorder %s829_s16, %s824_s7 }
  0x1d   : > { %p833_p12 = scmp.lt.u32.totalorder %s824_s7, %s1065_s30 }
  0x1e   : > { %p828_p7 = pneg %p827_p6  ;;  %p832_p13 = por %p831_p10, %p830_p4 }
  0x20   : > { %p834_p1 = por %p833_p12, %p832_p13 }
  0x22   : > { %p835_p2 = pnand %p834_p1, %p828_p7 }
  0x24   : > { %838 = shalt.err (!%p835_p2)
}
  0x25   : > { %s839_s20 = scalar_lea.vmem %s1067_s4, 512  ;;  %s972_s26 = smov [#allocation2]  }
  0x26   : > { %p840_p3 = scmp.ne.s32.totalorder %s1067_s4, %s839_s20  ;;  %s844_s27 = sshll.u32 %s972_s26, 4  ;;  %s845_s27 = int_to_ptr.vmem [resolvable:$false] %s844_s27 }
  0x27   : > { %s846_s28 = scalar_lea.vmem %s845_s27, 1024  ;;  %p847_p9 = scmp.lt.s32.totalorder %s1067_s4, %s845_s27 }
  0x28   : > { %p842_p6 = pnand %p840_p3, %p826_p5  ;;  %p848_p4 = scmp.lt.s32.totalorder %s846_s28, %s839_s20 }
  0x2a   : > { %p843_p11 = pneg %p842_p6  ;;  %p849_p10 = por %p848_p4, %p847_p9 }
  0x2c   : > { %p850_p12 = pnand %p849_p10, %p843_p11 }
  0x2e   : > { %853 = shalt.err (!%p850_p12)
}
  0x2f   : > { %761 = dma.hbm_to_vmem [thread:$0]  (!%p1071_p0), %s1065_s30, 512, %s1067_s4, %s134_s6  }
  0x30   : > { %p1345_p1 = scmp.lt.s32.totalorder %s970_s14, 3  ;;  %p1346_p2 = scmp.ge.s32.totalorder %s970_s14, 1 }
  0x31   : > { %s726_s3 = sshll.u32 %s1058_s25, 4  ;;  %s750_s7 = sshll.u32 %s966_s13, 8 }
  0x32   : > { %p1107_p7 = pnand %p1346_p2, %p1345_p1  ;;  %s1116_s16 = scalar_lea.hbm %s1336_s1, %s750_s7 }
  0x33   : > { %s156_s18 = scalar_lea.vmem [#allocation5], %s726_s3  ;;  %s153_s30 = scalar_lea.sflag [#allocation6], %s1058_s25 }
  0x34   : > { %s1347_s29 = scalar_select %p1107_p7, 1, 0 }
  0x35   : > { %s166_s19 = sshll.u32 %s156_s18, 4  ;;  %s854_s4 = scalar_lea.hbm %s1116_s16, 256  ;;  %s167_s19 = int_to_ptr.vmem [resolvable:$true] %s166_s19 }
  0x36   : > { %p855_p9 = scmp.ne.s32.totalorder %s1116_s16, %s854_s4  ;;  %s859_s26 = scalar_lea.hbm %s1336_s1, 512 }
  0x37   : > { %p860_p3 = scmp.lt.u32.totalorder %s1116_s16, %s1336_s1  ;;  %p861_p6 = scmp.lt.u32.totalorder %s859_s26, %s854_s4 }
  0x38   : > { %p857_p11 = pnand %p855_p9, %p826_p5  ;;  %p863_p10 = scmp.lt.u32.totalorder %s854_s4, %s1116_s16 }
  0x39   : > { %p862_p4 = por %p861_p6, %p860_p3 }
  0x3a   : > { %p858_p13 = pneg %p857_p11 }
  0x3b   : > { %p864_p12 = por %p863_p10, %p862_p4 }
  0x3d   : > { %p865_p1 = pnand %p864_p12, %p858_p13 }
  0x3f   : > { %868 = shalt.err (!%p865_p1)
}
  0x40   : > { %s869_s25 = scalar_lea.vmem %s167_s19, 256  ;;  %s973_s3 = smov [#allocation5]  }
  0x41   : > { %p870_p2 = scmp.ne.s32.totalorder %s167_s19, %s869_s25  ;;  %s874_s7 = sshll.u32 %s973_s3, 4  ;;  %s875_s7 = int_to_ptr.vmem [resolvable:$false] %s874_s7 }
  0x42   : > { %s876_s8 = scalar_lea.vmem %s875_s7, 512  ;;  %p877_p8 = scmp.lt.s32.totalorder %s167_s19, %s875_s7 }
  0x43   : > { %p872_p9 = pnand %p870_p2, %p826_p5  ;;  %p878_p7 = scmp.lt.s32.totalorder %s876_s8, %s869_s25 }
  0x45   : > { %p873_p11 = pneg %p872_p9  ;;  %p879_p3 = por %p878_p7, %p877_p8 }
  0x47   : > { %p880_p6 = pnand %p879_p3, %p873_p11 }
  0x49   : > { %883 = shalt.err (!%p880_p6)
}
  0x4a   : > { %764 = dma.hbm_to_vmem [thread:$0]  (!%p1071_p0), %s1116_s16, 256, %s167_s19, %s153_s30  }
  0x4b   : > { %p1348_p13 = scmp.ne.s32.totalorder %s1347_s29, 0 }
  0x4c   : > { %s1141_s15 = sand.u32 (!%p1348_p13), 1, %s954_s10   ;;  %p1349_p8 = scmp.ne.s32.totalorder (!%p1348_p13), %s1341_s21, 0 }
  0x4d   : > { %175 = sbr.rel (%p1348_p13) target bundleno = 270 (0x10e), region = 28  ;;  %s730_s18 = sshll.u32 (!%p1348_p13), %s1141_s15, 5 }
  0x4e   : > { %s178_s4 = scalar_lea.sflag (!%p1348_p13), [#allocation3], %s1141_s15  ;;  %s1145_s6 = scalar_lea.vmem (!%p1348_p13), [#allocation2], %s730_s18 }
  0x54   : > { %937 = dma.done.wait (%p1349_p8), %s178_s4, 512  }
  0x55   : > { %939 = vsyncadd (%p1349_p8), %s178_s4, 4294966784  ;;  %s731_s5 = sshll.u32 %s1141_s15, 4  ;;  %s187_s29 = scalar_lea.sflag [#allocation6], %s1141_s15 }
  0x56   : > { %s190_s16 = scalar_lea.vmem [#allocation5], %s731_s5 }
  0x57   : > { %941 = dma.done.wait (%p1349_p8), %s187_s29, 256  }
  0x58   : > { %943 = vsyncadd (%p1349_p8), %s187_s29, 4294967040  ;;  %v231_v0 = vlaneseq  ;;  %v974_v1 = vmov 1983009808   ;;  %v216_v9 = vld [vmem:[%s190_s16] sm:$0xff]  ;;  %v217_v10 = vld [vmem:[%s190_s16 + $0x8] sm:$0xff]  ;;  %s975_s21 = smov 127  }
  0x59   : > { %v229_v2 = vunpack.c.l.s4 %v974_v1  ;;  %v218_v11 = vld [vmem:[%s1145_s6] ss:$4 sm:$0xff]  ;;  %v227_v15 = vcombine.high %v216_v9, %v216_v9  ;;  %v244_v17 = vcombine.high %v217_v10, %v217_v10  ;;  %s976_s19 = smov 1   ;;  %v733_v45 = vld [vmem:[%s1145_s6 + $0x1] ss:$4 sm:$0xff]  ;;  %s751_s30 = sshll.u32 %s962_s12, 8 }
  0x5a   : > { %v232_v3 = vshrl.u32 %v231_v0, 7  ;;  %v1190_v44 = vand.u32 127, %v231_v0  ;;  %s215_s20 = scalar_lea.vmem [#allocation7], %s731_s5  ;;  %s1286_s25 = scalar_lea.hbm %s1337_s2, %s751_s30 }
  0x5b   : > { %v230_v4 = vunpack.c.0.s8 %v229_v2  ;;  %s612_s26 = sshll.u32 %s215_s20, 4  ;;  %s596_s12 = scalar_lea.sflag [#allocation4], %s1141_s15  ;;  %s1288_s26 = int_to_ptr.vmem [resolvable:$true] %s612_s26 }
  0x5c   : > { %v1161_v6 = vsub.s32 4, %v232_v3  ;;  %v1163_v7 = vsub.s32 0, %v232_v3  ;;  %v1165_v8 = vsub.s32 1, %v232_v3  ;;  %v1168_v12 = vsub.s32 2, %v232_v3  ;;  %s884_s3 = scalar_lea.vmem %s1288_s26, 256  ;;  %p1350_p5 = scmp.ne.s32.totalorder %s1342_s22, 0 }
  0x5d   : > { %v1159_v5 = vsub.s32 %v230_v4, %v232_v3  ;;  %v1170_v13 = vsub.s32 3, %v232_v3  ;;  %v1177_v21 = vsub.s32 5, %v232_v3  ;;  %v1184_v34 = vsub.s32 6, %v232_v3  ;;  %p885_p0 = scmp.ne.s32.totalorder %s1288_s26, %s884_s3  ;;  %s977_s7 = smov [#allocation7]  }
  0x5e   : > { %v341_v18 = vrot.slane %v218_v11, %v1161_v6  ;;  %v325_v19 = vrot.slane %v218_v11, %v1163_v7  ;;  %v329_v20 = vrot.slane %v218_v11, %v1165_v8  ;;  %v333_v29 = vrot.slane %v218_v11, %v1168_v12  ;;  %s888_s8 = sshll.u32 %s977_s7, 4  ;;  %s889_s8 = int_to_ptr.vmem [resolvable:$false] %s888_s8 }
  0x5f   : > { %v234_v14 = vrot.slane %v216_v9, %v1159_v5  ;;  %v251_v16 = vrot.slane %v217_v10, %v1159_v5  ;;  %v241_v22 = vrot.slane %v227_v15, %v1159_v5  ;;  %v258_v27 = vrot.slane %v244_v17, %v1159_v5  ;;  %p886_p7 = pnand %p885_p0, %p1350_p5  ;;  %s890_s18 = scalar_lea.vmem %s889_s8, 512 }
  0x60   : > { %v337_v31 = vrot.slane %v218_v11, %v1170_v13  ;;  %v345_v32 = vrot.slane %v218_v11, %v1177_v21  ;;  %v1186_v35 = vsub.s32 7, %v232_v3  ;;  %v349_v39 = vrot.slane %v218_v11, %v1184_v34  ;;  %p891_p10 = scmp.lt.s32.totalorder %s1288_s26, %s889_s8  ;;  %p892_p12 = scmp.lt.s32.totalorder %s890_s18, %s884_s3 }
  0x61   : > { %269 = vrot.lane.b32.xlu0 %v234_v14, %s975_s21  ;;  %v242_v23 = vcombine.high %v234_v14, %v234_v14  ;;  %v366_v24 = vmul.f32 %v341_v18, %v251_v16  ;;  %v362_v25 = vmul.f32 %v325_v19, %v234_v14  ;;  %273 = vrot.lane.b32.xlu1 %v241_v22, %s975_s21  ;;  %vm287_vm0 = vcmp.lt.s32.totalorder %v1190_v44, 127  ;;  %p887_p4 = pneg %p886_p7 }
  0x62   : > { %v259_v26 = vcombine.high %v251_v16, %v251_v16  ;;  %v243_v30 = vcombine.high %v241_v22, %v241_v22  ;;  %v364_v33 = vmul.f32 %v333_v29, %v241_v22  ;;  %v260_v38 = vcombine.high %v258_v27, %v258_v27  ;;  %v1227_v29 = vld [vmem:[%s1145_s6 + $0x3] ss:$4 sm:$0xff]  ;;  %p893_p1 = por %p892_p12, %p891_p10 }
  0x63   : > { %v363_v28 = vmul.f32 %v329_v20, %v242_v23  ;;  %v353_v40 = vrot.slane %v218_v11, %v1186_v35  ;;  %v368_v41 = vmul.f32 %v349_v39, %v258_v27  ;;  %v390_v48 = vrot.slane %v733_v45, %v1161_v6 }
  0x64   : > { %v365_v36 = vmul.f32 %v337_v31, %v243_v30  ;;  %v367_v37 = vmul.f32 %v345_v32, %v259_v26  ;;  %v374_v50 = vrot.slane %v733_v45, %v1163_v7  ;;  %v378_v51 = vrot.slane %v733_v45, %v1165_v8  ;;  %p894_p2 = pnand %p893_p1, %p887_p4 }
  0x65   : > { %277 = vrot.lane.b32.xlu0 %v251_v16, %s975_s21  ;;  %279 = vrot.lane.b32.xlu1 %v259_v26, %s975_s21  ;;  %v369_v42 = vmul.f32 %v353_v40, %v260_v38  ;;  %v382_v55 = vrot.slane %v733_v45, %v1168_v12  ;;  %v386_v56 = vrot.slane %v733_v45, %v1170_v13  ;;  %vm312_vm1 = vcmp.lt.s32.totalorder %v1190_v44, 1 }
  0x66   : > { %v394_v63 = vrot.slane %v733_v45, %v1177_v21  ;;  %v398_v2 = vrot.slane %v733_v45, %v1184_v34  ;;  %v402_v3 = vrot.slane %v733_v45, %v1186_v35 }
  0x69   : > { %271 = vrot.lane.b32.xlu0 %v242_v23, %s975_s21  ;;  %275 = vrot.lane.b32.xlu1 %v243_v30, %s975_s21 }
  0x6d   : > { %281 = vrot.lane.b32.xlu0 %v258_v27, %s975_s21  ;;  %283 = vrot.lane.b32.xlu1 %v260_v38, %s975_s21 }
  0x71   : > { %296 = vrot.lane.b32.xlu0 %v234_v14, %s976_s19  ;;  %298 = vrot.lane.b32.xlu1 %v242_v23, %s976_s19 }
  0x75   : > { %300 = vrot.lane.b32.xlu0 %v241_v22, %s976_s19  ;;  %302 = vrot.lane.b32.xlu1 %v243_v30, %s976_s19 }
  0x79   : > { %304 = vrot.lane.b32.xlu0 %v251_v16, %s976_s19  ;;  %306 = vrot.lane.b32.xlu1 %v259_v26, %s976_s19  ;;  %v1217_v16 = vld [vmem:[%s1145_s6 + $0x2] ss:$4 sm:$0xff] }
  0x7a   : > { %v443_v40 = vrot.slane %v1217_v16, %v1170_v13 }
  0x7d   : > { %308 = vrot.lane.b32.xlu0 %v258_v27, %s976_s19  ;;  %310 = vrot.lane.b32.xlu1 %v260_v38, %s976_s19 }
  0xd3   : > { %v270_v43 = vpop.permute.xlu0 %269  ;;  %v274_v46 = vpop.permute.xlu1 %273 }
  0xd7   : > { %v278_v47 = vpop.permute.xlu0 %277  ;;  %v280_v49 = vpop.permute.xlu1 %279 }
  0xd8   : > { %v290_v52 = vsel %vm287_vm0, %v278_v47, %v280_v49 }
  0xd9   : > { %v415_v53 = vmul.f32 %v390_v48, %v290_v52 }
  0xdb   : > { %v272_v54 = vpop.permute.xlu0 %271  ;;  %v423_v59 = vadd.f32 %v415_v53, %v366_v24  ;;  %v276_v62 = vpop.permute.xlu1 %275  ;;  %v451_v53 = vrot.slane %v1217_v16, %v1177_v21 }
  0xdc   : > { %v293_v57 = vsel %vm287_vm0, %v272_v54, %v274_v46  ;;  %v294_v58 = vsel %vm287_vm0, %v270_v43, %v272_v54  ;;  %v291_v0 = vsel %vm287_vm0, %v276_v62, %v278_v47  ;;  %v292_v1 = vsel %vm287_vm0, %v274_v46, %v276_v62 }
  0xdd   : > { %v411_v60 = vmul.f32 %v374_v50, %v294_v58  ;;  %v412_v61 = vmul.f32 %v378_v51, %v293_v57  ;;  %v413_v10 = vmul.f32 %v382_v55, %v292_v1  ;;  %v414_v11 = vmul.f32 %v386_v56, %v291_v0 }
  0xde   : > { %v447_v47 = vrot.slane %v1217_v16, %v1161_v6  ;;  %v455_v58 = vrot.slane %v1217_v16, %v1184_v34  ;;  %v431_v1 = vrot.slane %v1217_v16, %v1163_v7 }
  0xdf   : > { %v1212_v4 = vadd.f32 %v411_v60, %v362_v25  ;;  %v420_v9 = vadd.f32 %v412_v61, %v363_v28  ;;  %v282_v14 = vpop.permute.xlu0 %281  ;;  %v421_v17 = vadd.f32 %v413_v10, %v364_v33  ;;  %v422_v18 = vadd.f32 %v414_v11, %v365_v36  ;;  %v284_v20 = vpop.permute.xlu1 %283 }
  0xe0   : > { %v289_v15 = vsel %vm287_vm0, %v280_v49, %v282_v14  ;;  %v288_v22 = vsel %vm287_vm0, %v282_v14, %v284_v20  ;;  %v295_v23 = vsel %vm287_vm0, %v284_v20, %v270_v43  ;;  %v435_v28 = vrot.slane %v1217_v16, %v1165_v8 }
  0xe1   : > { %v416_v19 = vmul.f32 %v394_v63, %v289_v15  ;;  %v417_v25 = vmul.f32 %v398_v2, %v288_v22  ;;  %v418_v26 = vmul.f32 %v402_v3, %v295_v23  ;;  %v439_v33 = vrot.slane %v1217_v16, %v1168_v12 }
  0xe2   : > { %v508_v60 = vrot.slane %v1227_v29, %v1177_v21  ;;  %v512_v3 = vrot.slane %v1227_v29, %v1184_v34  ;;  %v459_v21 = vrot.slane %v1217_v16, %v1186_v35  ;;  %v488_v22 = vrot.slane %v1227_v29, %v1163_v7 }
  0xe3   : > { %v424_v24 = vadd.f32 %v416_v19, %v367_v37  ;;  %v297_v27 = vpop.permute.xlu0 %296  ;;  %v425_v30 = vadd.f32 %v417_v25, %v368_v41  ;;  %v426_v31 = vadd.f32 %v418_v26, %v369_v42  ;;  %v299_v32 = vpop.permute.xlu1 %298  ;;  %v492_v37 = vrot.slane %v1227_v29, %v1165_v8 }
  0xe4   : > { %v319_v36 = vsel %vm312_vm1, %v297_v27, %v299_v32  ;;  %v496_v42 = vrot.slane %v1227_v29, %v1168_v12  ;;  %v500_v8 = vrot.slane %v1227_v29, %v1170_v13  ;;  %v504_v12 = vrot.slane %v1227_v29, %v1161_v6 }
  0xe5   : > { %v469_v38 = vmul.f32 %v435_v28, %v319_v36  ;;  %v516_v16 = vrot.slane %v1227_v29, %v1186_v35 }
  0xe7   : > { %v301_v39 = vpop.permute.xlu0 %300  ;;  %v477_v41 = vadd.f32 %v469_v38, %v420_v9  ;;  %v303_v46 = vpop.permute.xlu1 %302 }
  0xe8   : > { %v318_v43 = vsel %vm312_vm1, %v299_v32, %v301_v39  ;;  %v317_v48 = vsel %vm312_vm1, %v301_v39, %v303_v46 }
  0xe9   : > { %v470_v45 = vmul.f32 %v439_v33, %v318_v43  ;;  %v526_v49 = vadd.f32 %v492_v37, %v477_v41  ;;  %v471_v51 = vmul.f32 %v443_v40, %v317_v48 }
  0xeb   : > { %v478_v50 = vadd.f32 %v470_v45, %v421_v17  ;;  %v305_v52 = vpop.permute.xlu0 %304  ;;  %v479_v56 = vadd.f32 %v471_v51, %v422_v18  ;;  %v307_v13 = vpop.permute.xlu1 %306 }
  0xec   : > { %v316_v54 = vsel %vm312_vm1, %v303_v46, %v305_v52  ;;  %v315_v61 = vsel %vm312_vm1, %v305_v52, %v307_v13 }
  0xed   : > { %v527_v55 = vadd.f32 %v496_v42, %v478_v50  ;;  %v472_v57 = vmul.f32 %v447_v47, %v316_v54  ;;  %v528_v62 = vadd.f32 %v500_v8, %v479_v56  ;;  %v473_v0 = vmul.f32 %v451_v53, %v315_v61 }
  0xef   : > { %v480_v63 = vadd.f32 %v472_v57, %v423_v59  ;;  %v309_v6 = vpop.permute.xlu0 %308  ;;  %v738_v2 = vclamps-f32 %v527_v55, 6.0  ;;  %v739_v10 = vclamps-f32 %v528_v62, 6.0  ;;  %v481_v14 = vadd.f32 %v473_v0, %v424_v24  ;;  %v311_v59 = vpop.permute.xlu1 %310 }
  0xf0   : > { %v314_v9 = vsel %vm312_vm1, %v307_v13, %v309_v6  ;;  %v313_v17 = vsel %vm312_vm1, %v309_v6, %v311_v59  ;;  %v320_v18 = vsel %vm312_vm1, %v311_v59, %v297_v27 }
  0xf1   : > { %v529_v11 = vadd.f32 %v504_v12, %v480_v63  ;;  %v474_v15 = vmul.f32 %v455_v58, %v314_v9  ;;  %v558_v19 = vcombine.low %v738_v2, %v739_v10  ;;  %v530_v20 = vadd.f32 %v508_v60, %v481_v14 }
  0xf2   : > { %v468_v23 = vmul.f32 %v431_v1, %v320_v18  ;;  %v475_v24 = vmul.f32 %v459_v21, %v313_v17 }
  0xf3   : > { %v482_v34 = vadd.f32 %v474_v15, %v425_v30  ;;  %v740_v25 = vclamps-f32 %v529_v11, 6.0  ;;  %v741_v26 = vclamps-f32 %v530_v20, 6.0  ;;  %v737_v30 = vclamps-f32 %v526_v49, 6.0 }
  0xf4   : > { %v476_v32 = vadd.f32 %v468_v23, %v1212_v4  ;;  %v483_v44 = vadd.f32 %v475_v24, %v426_v31  ;;  %v572_v29 = vrot.slane %v558_v19, %v1159_v5 }
  0xf5   : > { %v531_v28 = vadd.f32 %v512_v3, %v482_v34  ;;  %v574_v27 = vcombine.low %v740_v25, %v741_v26 }
  0xf6   : > { %v525_v33 = vadd.f32 %v488_v22, %v476_v32  ;;  %v532_v36 = vadd.f32 %v516_v16, %v483_v44 }
  0xf7   : > { %v742_v37 = vclamps-f32 %v531_v28, 6.0  ;;  %v582_v4 = vrot.slane %v574_v27, %v1159_v5 }
  0xf8   : > { %v736_v38 = vclamps-f32 %v525_v33, 6.0  ;;  %v743_v7 = vclamps-f32 %v532_v36, 6.0 }
  0xfa   : > { %v557_v39 = vcombine.low %v736_v38, %v737_v30  ;;  %v575_v35 = vcombine.low %v742_v37, %v743_v7 }
  0xfc   : > { %v565_v31 = vrot.slane %v557_v39, %v1159_v5  ;;  %v589_v40 = vrot.slane %v575_v35, %v1159_v5 }
  0xfe   : > { %v573_v43 = vcombine.low %v565_v31, %v572_v29  ;;  %v590_v41 = vcombine.low %v582_v4, %v589_v40 }
 0x100   : > { %593 = vst [vmem:[%s215_s20] sm:$0xff] %v573_v43  ;;  %594 = vst [vmem:[%s215_s20 + $0x8] sm:$0xff] %v590_v41 }
 0x101   : > { %897 = shalt.err (!%p894_p2)
}
 0x102   : > { %s898_s15 = scalar_lea.hbm %s1286_s25, 256  ;;  %s902_s5 = scalar_lea.hbm %s1337_s2, 512 }
 0x103   : > { %p899_p9 = scmp.ne.s32.totalorder %s1286_s25, %s898_s15  ;;  %p903_p6 = scmp.lt.u32.totalorder %s1286_s25, %s1337_s2 }
 0x104   : > { %p904_p13 = scmp.lt.u32.totalorder %s902_s5, %s898_s15  ;;  %p906_p0 = scmp.lt.u32.totalorder %s898_s15, %s1286_s25 }
 0x105   : > { %p900_p11 = pnand %p899_p9, %p1350_p5 }
 0x106   : > { %p905_p8 = por %p904_p13, %p903_p6 }
 0x107   : > { %p901_p3 = pneg %p900_p11 }
 0x108   : > { %p907_p7 = por %p906_p0, %p905_p8 }
 0x10a   : > { %p908_p4 = pnand %p907_p7, %p901_p3 }
 0x10c   : > { %911 = shalt.err (!%p908_p4)
}
 0x10d   : > { %756 = dma.vmem_to_hbm [thread:$0]  (%p1350_p5), %s1288_s26, 256, %s1286_s25, %s596_s12  }
 0x10e PF: > { %s624_s21 = sand.u32 1, %s950_s9   ;;  %p1351_p10 = scmp.ne.s32.totalorder %s1343_s24, 0 }
 0x10f   : > { %p1352_p12 = scmp.ge.s32.totalorder %s970_s14, 2  ;;  %s625_s19 = scalar_lea.sflag [#allocation4], %s624_s21 }
 0x111   : > { %p766_p1 = pnand %p1352_p12, %p1351_p10 }
 0x113   : > { %945 = dma.done.wait (!%p766_p1), %s625_s19, 256  }
 0x114   : > { %947 = vsyncadd (!%p766_p1), %s625_s19, 4294967040  ;;  %s21_s14 = sadd.s32 1, %s970_s14   ;;  %s1353_s9 = smov %s954_s10 }
 0x115   : > { %p18_p2 = scmp.ge.s32.totalorder %s21_s14, 4   ;;  %s1354_s10 = smov %s958_s11 }
 0x116   : > { %s1355_s11 = smov %s1049_s23  ;;  %s1356_s12 = smov %s966_s13 }
 0x117   : > { %s1357_s13 = smov %s1359_s17  ;;  %20 = sbr.rel (!%p18_p2) target bundleno = 8 (0x8), region = 89 }
 0x11e   :  { %630 = vsyncpa [#allocation3], 1 }
 0x11f   :  { %632 = vsyncpa [#allocation3 + $0x1], 1 }
 0x120   :  { %633 = vsyncpa [#allocation6], 1 }
 0x121   :  { %635 = vsyncpa [#allocation6 + $0x1], 1 }
 0x122   :  { %636 = vsyncpa [#allocation4], 1 }
 0x123   :  { %638 = vsyncpa [#allocation4 + $0x1], 1 }

</bundles_post_ra>
